<compile_context>
chip_gen: v6e
topology: v6e:2x2x1
jax: 0.10.0
libtpu: 0.0.40
codegen_flags: <defaults>
</compile_context>

<pallas_src>
import functools

import jax
import jax.numpy as jnp
from jax.experimental import pallas as pl
from jax.experimental.pallas import tpu as pltpu


def _aggregate_kernel(mask_ref, feats_ref, acc_ref, cnt_ref):
    """Partial neighbor-sum / neighbor-count for one (core, node-tile) step.

    mask_ref : VMEM (B, tile_n)   sampled-neighbor 0/1 mask tile
    feats_ref: VMEM (tile_n, F)   feature-table tile
    acc_ref  : VMEM (B, F) f32    per-core partial sum   (output, resident)
    cnt_ref  : VMEM (B, 1) f32    per-core partial count (output, resident)
    """
    @pl.when(pl.program_id(1) == 0)
    def _init():
        acc_ref[...] = jnp.zeros_like(acc_ref)
        cnt_ref[...] = jnp.zeros_like(cnt_ref)

    mask = mask_ref[...]
    acc_ref[...] += jnp.dot(mask, feats_ref[...],
                            preferred_element_type=jnp.float32)
    cnt_ref[...] += jnp.sum(mask.astype(jnp.float32), axis=-1, keepdims=True)


def _combine_kernel(self_ref, acc_ref, cnt_ref, ws_ref, wn_ref, out_ref):
    """Combine per-core partials and encode: relu(self@Ws^T + neigh@Wn^T).

    self_ref: (B, F)            gathered self features (compute dtype)
    acc_ref : (P, B, F) f32     per-core partial neighbor sums
    cnt_ref : (P, B, 1) f32     per-core partial neighbor counts
    ws_ref  : (F, E) f32        W_self pre-transposed
    wn_ref  : (F, E) f32        W_neigh pre-transposed
    out_ref : (B, E) f32        lane-dense output tile
    """
    acc = jnp.sum(acc_ref[...], axis=0)            # (B, F) f32
    cnt = jnp.sum(cnt_ref[...], axis=0)            # (B, 1) f32
    # max(count, 1): the PyTorch MeanAggregator would divide by zero for a
    # node with no sampled neighbors -- intentional, documented divergence.
    neigh = acc / jnp.maximum(cnt, 1.0)
    out = jnp.dot(self_ref[...].astype(jnp.float32), ws_ref[...],
                  preferred_element_type=jnp.float32)
    out += jnp.dot(neigh, wn_ref[...], preferred_element_type=jnp.float32)
    out_ref[...] = jnp.maximum(out, 0.0)           # relu


def _auto_tile_n(n_per_core, feat_dim, batch, dtype_bytes,
                 vmem_budget=32 * 1024 * 1024):
    """Largest node-tile (multiple of 128, <=2048) whose double-buffered
    feats+mask tiles fit a conservative cross-generation VMEM budget."""
    per_row = (feat_dim + batch) * dtype_bytes
    tile = (vmem_budget // 2 - (1 << 20)) // max(per_row, 1)
    tile = min(tile, 2048)
    need = ((n_per_core + 127) // 128) * 128       # never bigger than needed
    tile = min(tile, need)
    tile = max(128, (tile // 128) * 128)
    return int(tile)


@functools.partial(jax.jit, static_argnames=("tile_n", "num_cores"))
def encoder_forward(nodes, features, neigh_mask, weight, *,
                    tile_n=None, num_cores=2):
    """Full Encoder.forward (gcn=False).  Returns (embed_dim, batch).

    `features` / `neigh_mask` should be stored persistently in the desired
    compute dtype (bf16 recommended -- halves HBM bytes of the dominant
    stream on all TPU generations); no per-call table cast happens here.
    The weights stay f32 in-kernel.
    """
    B = nodes.shape[0]
    N, F = features.shape
    E = weight.shape[0]
    assert weight.shape[1] == 2 * F
    assert neigh_mask.shape == (B, N)

    compute_dtype = features.dtype
    if neigh_mask.dtype != compute_dtype:          # trace-time no-op if matched
        neigh_mask = neigh_mask.astype(compute_dtype)
    nodes = nodes.astype(jnp.int32)

    dtype_bytes = jnp.dtype(compute_dtype).itemsize
    n_per_core = -(-N // num_cores)
    if tile_n is None:
        tile_n = _auto_tile_n(n_per_core, F, B, dtype_bytes)

    # Pad the node axis to a multiple of num_cores * tile_n.  Zero mask
    # columns contribute nothing to the sums or counts, so this is exact.
    # (Store the table pre-padded to make this a trace-time no-op.)
    n_pad = -(-N // (num_cores * tile_n)) * (num_cores * tile_n)
    if n_pad != N:
        features = jnp.pad(features, ((0, n_pad - N), (0, 0)))
        neigh_mask = jnp.pad(neigh_mask, ((0, 0), (0, n_pad - N)))
    nt_per_core = n_pad // (num_cores * tile_n)

    # ---- pass 1: per-core partial neighbor sums + counts -------------------
    vmem_limit = int(2 * (tile_n * F + B * tile_n) * dtype_bytes  # dbl-buffered
                     + 4 * (B * F + B) * 4                        # output bufs
                     + (8 << 20))                                 # headroom
    vmem_limit = min(vmem_limit, 64 * 1024 * 1024)                # v7x physical

    partial_acc, partial_cnt = pl.pallas_call(
        _aggregate_kernel,
        out_shape=(
            jax.ShapeDtypeStruct((num_cores, B, F), jnp.float32),
            jax.ShapeDtypeStruct((num_cores, B, 1), jnp.float32),
        ),
        grid_spec=pltpu.PrefetchScalarGridSpec(
            num_scalar_prefetch=0,
            grid=(num_cores, nt_per_core),        # reduction axis last
            in_specs=[
                pl.BlockSpec((B, tile_n),
                             lambda p, n: (0, p * nt_per_core + n)),
                pl.BlockSpec((tile_n, F),
                             lambda p, n: (p * nt_per_core + n, 0)),
            ],
            out_specs=[
                pl.BlockSpec((None, B, F), lambda p, n: (p, 0, 0)),
                pl.BlockSpec((None, B, 1), lambda p, n: (p, 0, 0)),
            ],
        ),
        compiler_params=pltpu.CompilerParams(
            dimension_semantics=("parallel", "arbitrary"),
            vmem_limit_bytes=vmem_limit,
        ),
    )(neigh_mask, features)

    # ---- pass 2: combine + encode (tiny) ------------------------------------
    self_feats = features[nodes]                       # (B, F), negligible
    w_self_t = weight[:, :F].T.astype(jnp.float32)     # (F, E), trace-time
    w_neigh_t = weight[:, F:].T.astype(jnp.float32)    # (F, E)

    out_be = pl.pallas_call(
        _combine_kernel,
        out_shape=jax.ShapeDtypeStruct((B, E), jnp.float32),
        grid_spec=pltpu.PrefetchScalarGridSpec(
            num_scalar_prefetch=0,
            grid=(1,),
            in_specs=[
                pl.BlockSpec((B, F), lambda i: (0, 0)),
                pl.BlockSpec((num_cores, B, F), lambda i: (0, 0, 0)),
                pl.BlockSpec((num_cores, B, 1), lambda i: (0, 0, 0)),
                pl.BlockSpec((F, E), lambda i: (0, 0)),
                pl.BlockSpec((F, E), lambda i: (0, 0)),
            ],
            out_specs=pl.BlockSpec((B, E), lambda i: (0, 0)),
        ),
        compiler_params=pltpu.CompilerParams(
            dimension_semantics=("arbitrary",),
        ),
    )(self_feats, partial_acc, partial_cnt, w_self_t, w_neigh_t)

    # PyTorch layout: relu(W @ combined.T) has shape (E, B).
    return out_be.T


if __name__ == "__main__":
    key = jax.random.PRNGKey(0)
    k_feat, k_adj, k_w = jax.random.split(key, 3)

    NUM_NODES = 1024    # graph size / feature-table rows
    FEAT_DIM = 128      # feat_dim (lane-aligned)
    EMBED_DIM = 128     # embed_dim (lane-aligned -> lane-dense output)
    BATCH = 8           # len(nodes) (sublane-aligned)
    NUM_SAMPLE = 10
    TILE_N = 256        # f32-path tile -> grid (2 cores, 2 reduction steps)

    features_f32 = jax.random.normal(k_feat, (NUM_NODES, FEAT_DIM),
                                     dtype=jnp.float32)
    nodes = jnp.arange(BATCH, dtype=jnp.int32)

    # TODO(synk): deterministic stand-in for adj_lists + random.sample: a 0/1
    # mask with ~NUM_SAMPLE sampled neighbors per node in expectation.
    rand = jax.random.uniform(k_adj, (BATCH, NUM_NODES))
    neigh_mask_f32 = (rand < NUM_SAMPLE / NUM_NODES).astype(jnp.float32)

    # Xavier-uniform weight, (embed_dim, 2 * feat_dim) for gcn=False.
    fan_in, fan_out = 2 * FEAT_DIM, EMBED_DIM
    bound = (6.0 / (fan_in + fan_out)) ** 0.5
    weight = jax.random.uniform(k_w, (EMBED_DIM, 2 * FEAT_DIM),
                                minval=-bound, maxval=bound, dtype=jnp.float32)

    # Pure-JAX reference.
    self_feats = features_f32[nodes]
    counts = jnp.maximum(neigh_mask_f32.sum(axis=-1, keepdims=True), 1.0)
    neigh_feats = (neigh_mask_f32 @ features_f32) / counts
    combined = jnp.concatenate([self_feats, neigh_feats], axis=1)
    ref = jnp.maximum(weight @ combined.T, 0.0)

    # f32 streaming path (explicit tile).
    out_f32 = encoder_forward(nodes, features_f32, neigh_mask_f32, weight,
                              tile_n=TILE_N)
    out_f32 = jax.block_until_ready(out_f32)
    assert out_f32.shape == (EMBED_DIM, BATCH)
    assert jnp.allclose(out_f32, ref, atol=3e-2, rtol=3e-2)

    # bf16 streaming path: the table / mask are stored persistently in bf16
    # (cast once, outside the per-call path); weights stay f32 in-kernel.
    features_bf16 = features_f32.astype(jnp.bfloat16)
    neigh_mask_bf16 = neigh_mask_f32.astype(jnp.bfloat16)
    out_bf16 = encoder_forward(nodes, features_bf16, neigh_mask_bf16, weight)
    out_bf16 = jax.block_until_ready(out_bf16)
    assert out_bf16.shape == (EMBED_DIM, BATCH)
    assert jnp.allclose(out_bf16, ref, atol=1e-1, rtol=1e-1)

    print("KERNEL_OK")
</pallas_src>

<mosaic_0001>
module attributes {stable_mosaic.version = 11 : i64} {
  func.func @_aggregate_kernel(%arg0: i32, %arg1: i32, %arg2: memref<8x256xf32, #tpu.memory_space<vmem>>, %arg3: memref<256x128xf32, #tpu.memory_space<vmem>>, %arg4: memref<1x8x128xf32, #tpu.memory_space<vmem>>, %arg5: memref<1x8x1xf32, #tpu.memory_space<vmem>>) attributes {dimension_semantics = [#tpu.dimension_semantics<parallel>, #tpu.dimension_semantics<arbitrary>], iteration_bounds = array<i64: 2, 2>, scalar_prefetch = 0 : i64, scratch_operands = 0 : i64, tpu.core_type = #tpu.core_type<tc>, window_params = [{transform_indices = @transform_0, window_bounds = array<i64: 8, 256>}, {transform_indices = @transform_1, window_bounds = array<i64: 256, 128>}, {transform_indices = @transform_2, window_bounds = array<i64: 1, 8, 128>}, {transform_indices = @transform_3, window_bounds = array<i64: 1, 8, 1>}]} {
    %c0_i32 = arith.constant 0 : i32
    %0 = arith.cmpi eq, %arg1, %c0_i32 : i32
    %1 = arith.extui %0 : i1 to i32
    %c0_i32_0 = arith.constant 0 : i32
    %2 = arith.cmpi ne, %1, %c0_i32_0 : i32
    scf.if %2 {
      %cst_17 = arith.constant 0.000000e+00 : f32
      %20 = vector.broadcast %cst_17 : f32 to vector<8x128xf32>
      %c0_18 = arith.constant 0 : index
      %c0_19 = arith.constant 0 : index
      %c0_20 = arith.constant 0 : index
      %21 = vector.load %arg4[%c0_18, %c0_19, %c0_20] : memref<1x8x128xf32, #tpu.memory_space<vmem>>, vector<1x8x128xf32>
      %22 = vector.shape_cast %21 : vector<1x8x128xf32> to vector<8x128xf32>
      %23 = vector.shape_cast %20 : vector<8x128xf32> to vector<1x8x128xf32>
      tpu.vector_store %arg4[%c0_18, %c0_19, %c0_20], %23 {strides = array<i32>} : memref<1x8x128xf32, #tpu.memory_space<vmem>>, vector<1x8x128xf32>,
      %cst_21 = arith.constant 0.000000e+00 : f32
      %24 = vector.broadcast %cst_21 : f32 to vector<8x1xf32>
      %c0_22 = arith.constant 0 : index
      %c0_23 = arith.constant 0 : index
      %c0_24 = arith.constant 0 : index
      %25 = vector.load %arg5[%c0_22, %c0_23, %c0_24] : memref<1x8x1xf32, #tpu.memory_space<vmem>>, vector<1x8x1xf32>
      %26 = vector.shape_cast %25 : vector<1x8x1xf32> to vector<8x1xf32>
      %27 = vector.shape_cast %24 : vector<8x1xf32> to vector<1x8x1xf32>
      tpu.vector_store %arg5[%c0_22, %c0_23, %c0_24], %27 {strides = array<i32>} : memref<1x8x1xf32, #tpu.memory_space<vmem>>, vector<1x8x1xf32>,
    } else {
    }
    %c0 = arith.constant 0 : index
    %c0_1 = arith.constant 0 : index
    %3 = vector.load %arg2[%c0, %c0_1] : memref<8x256xf32, #tpu.memory_space<vmem>>, vector<8x256xf32>
    %c0_2 = arith.constant 0 : index
    %c0_3 = arith.constant 0 : index
    %c0_4 = arith.constant 0 : index
    %4 = vector.load %arg4[%c0_2, %c0_3, %c0_4] : memref<1x8x128xf32, #tpu.memory_space<vmem>>, vector<1x8x128xf32>
    %5 = vector.shape_cast %4 : vector<1x8x128xf32> to vector<8x128xf32>
    %c0_5 = arith.constant 0 : index
    %c0_6 = arith.constant 0 : index
    %6 = vector.load %arg3[%c0_5, %c0_6] : memref<256x128xf32, #tpu.memory_space<vmem>>, vector<256x128xf32>
    %cst = arith.constant dense<0.000000e+00> : vector<8x128xf32>
    %7 = tpu.matmul %3, %6, %cst {dimension_numbers = #tpu.dot_dimension_numbers<[1], [0], [0], [1], [0, 0, 1, 1], [], []>} : vector<8x256xf32>, vector<256x128xf32>, vector<8x128xf32> -> vector<8x128xf32>
    %8 = arith.addf %5, %7 : vector<8x128xf32>
    %c0_7 = arith.constant 0 : index
    %c0_8 = arith.constant 0 : index
    %c0_9 = arith.constant 0 : index
    %9 = vector.load %arg4[%c0_7, %c0_8, %c0_9] : memref<1x8x128xf32, #tpu.memory_space<vmem>>, vector<1x8x128xf32>
    %10 = vector.shape_cast %9 : vector<1x8x128xf32> to vector<8x128xf32>
    %11 = vector.shape_cast %8 : vector<8x128xf32> to vector<1x8x128xf32>
    tpu.vector_store %arg4[%c0_7, %c0_8, %c0_9], %11 {strides = array<i32>} : memref<1x8x128xf32, #tpu.memory_space<vmem>>, vector<1x8x128xf32>,
    %c0_10 = arith.constant 0 : index
    %c0_11 = arith.constant 0 : index
    %c0_12 = arith.constant 0 : index
    %12 = vector.load %arg5[%c0_10, %c0_11, %c0_12] : memref<1x8x1xf32, #tpu.memory_space<vmem>>, vector<1x8x1xf32>
    %13 = vector.shape_cast %12 : vector<1x8x1xf32> to vector<8x1xf32>
    %cst_13 = arith.constant dense<0.000000e+00> : vector<8xf32>
    %14 = vector.multi_reduction <add>, %3, %cst_13 [1] : vector<8x256xf32> to vector<8xf32>
    %15 = vector.shape_cast %14 : vector<8xf32> to vector<8x1xf32>
    %16 = arith.addf %13, %15 : vector<8x1xf32>
    %c0_14 = arith.constant 0 : index
    %c0_15 = arith.constant 0 : index
    %c0_16 = arith.constant 0 : index
    %17 = vector.load %arg5[%c0_14, %c0_15, %c0_16] : memref<1x8x1xf32, #tpu.memory_space<vmem>>, vector<1x8x1xf32>
    %18 = vector.shape_cast %17 : vector<1x8x1xf32> to vector<8x1xf32>
    %19 = vector.shape_cast %16 : vector<8x1xf32> to vector<1x8x1xf32>
    tpu.vector_store %arg5[%c0_14, %c0_15, %c0_16], %19 {strides = array<i32>} : memref<1x8x1xf32, #tpu.memory_space<vmem>>, vector<1x8x1xf32>,
    return
  }
  func.func @transform_0(%arg0: i32, %arg1: i32) -> (i32, i32) {
    %c2_i32 = arith.constant 2 : i32
    %0 = arith.muli %arg0, %c2_i32 : i32
    %1 = arith.addi %0, %arg1 : i32
    %c0_i32 = arith.constant 0 : i32
    %c0_i32_0 = arith.constant 0 : i32
    return %c0_i32, %1 : i32, i32
  }
  func.func @transform_1(%arg0: i32, %arg1: i32) -> (i32, i32) {
    %c2_i32 = arith.constant 2 : i32
    %0 = arith.muli %arg0, %c2_i32 : i32
    %1 = arith.addi %0, %arg1 : i32
    %c0_i32 = arith.constant 0 : i32
    %c0_i32_0 = arith.constant 0 : i32
    return %1, %c0_i32 : i32, i32
  }
  func.func @transform_2(%arg0: i32, %arg1: i32) -> (i32, i32, i32) {
    %c0_i32 = arith.constant 0 : i32
    %c0_i32_0 = arith.constant 0 : i32
    %c0_i32_1 = arith.constant 0 : i32
    return %arg0, %c0_i32, %c0_i32_0 : i32, i32, i32
  }
  func.func @transform_3(%arg0: i32, %arg1: i32) -> (i32, i32, i32) {
    %c0_i32 = arith.constant 0 : i32
    %c0_i32_0 = arith.constant 0 : i32
    %c0_i32_1 = arith.constant 0 : i32
    return %arg0, %c0_i32, %c0_i32_0 : i32, i32, i32
  }
}

module attributes {stable_mosaic.version = 11 : i64} {
  func.func @_combine_kernel(%arg0: i32, %arg1: memref<8x128xf32, #tpu.memory_space<vmem>>, %arg2: memref<2x8x128xf32, #tpu.memory_space<vmem>>, %arg3: memref<2x8x1xf32, #tpu.memory_space<vmem>>, %arg4: memref<128x128xf32, #tpu.memory_space<vmem>>, %arg5: memref<128x128xf32, #tpu.memory_space<vmem>>, %arg6: memref<8x128xf32, #tpu.memory_space<vmem>>) attributes {dimension_semantics = [#tpu.dimension_semantics<arbitrary>], iteration_bounds = array<i64: 1>, scalar_prefetch = 0 : i64, scratch_operands = 0 : i64, tpu.core_type = #tpu.core_type<tc>, window_params = [{pipeline_mode = #tpu.pipeline_mode<synchronous>, transform_indices = @transform_0, window_bounds = array<i64: 8, 128>}, {pipeline_mode = #tpu.pipeline_mode<synchronous>, transform_indices = @transform_1, window_bounds = array<i64: 2, 8, 128>}, {pipeline_mode = #tpu.pipeline_mode<synchronous>, transform_indices = @transform_2, window_bounds = array<i64: 2, 8, 1>}, {pipeline_mode = #tpu.pipeline_mode<synchronous>, transform_indices = @transform_3, window_bounds = array<i64: 128, 128>}, {pipeline_mode = #tpu.pipeline_mode<synchronous>, transform_indices = @transform_4, window_bounds = array<i64: 128, 128>}, {pipeline_mode = #tpu.pipeline_mode<synchronous>, transform_indices = @transform_5, window_bounds = array<i64: 8, 128>}]} {
    %c0 = arith.constant 0 : index
    %c0_0 = arith.constant 0 : index
    %c0_1 = arith.constant 0 : index
    %0 = vector.load %arg2[%c0, %c0_0, %c0_1] : memref<2x8x128xf32, #tpu.memory_space<vmem>>, vector<2x8x128xf32>
    %cst = arith.constant dense<0.000000e+00> : vector<8x128xf32>
    %1 = vector.multi_reduction <add>, %0, %cst [0] : vector<2x8x128xf32> to vector<8x128xf32>
    %c0_2 = arith.constant 0 : index
    %c0_3 = arith.constant 0 : index
    %c0_4 = arith.constant 0 : index
    %2 = vector.load %arg3[%c0_2, %c0_3, %c0_4] : memref<2x8x1xf32, #tpu.memory_space<vmem>>, vector<2x8x1xf32>
    %cst_5 = arith.constant dense<0.000000e+00> : vector<8x1xf32>
    %3 = vector.multi_reduction <add>, %2, %cst_5 [0] : vector<2x8x1xf32> to vector<8x1xf32>
    %cst_6 = arith.constant 1.000000e+00 : f32
    %4 = vector.broadcast %cst_6 : f32 to vector<8x1xf32>
    %5 = arith.maximumf %3, %4 : vector<8x1xf32>
    %6 = vector.broadcast %5 : vector<8x1xf32> to vector<8x128xf32>
    %7 = arith.divf %1, %6 : vector<8x128xf32>
    %c0_7 = arith.constant 0 : index
    %c0_8 = arith.constant 0 : index
    %8 = vector.load %arg1[%c0_7, %c0_8] : memref<8x128xf32, #tpu.memory_space<vmem>>, vector<8x128xf32>
    %c0_9 = arith.constant 0 : index
    %c0_10 = arith.constant 0 : index
    %9 = vector.load %arg4[%c0_9, %c0_10] : memref<128x128xf32, #tpu.memory_space<vmem>>, vector<128x128xf32>
    %cst_11 = arith.constant dense<0.000000e+00> : vector<8x128xf32>
    %10 = tpu.matmul %8, %9, %cst_11 {dimension_numbers = #tpu.dot_dimension_numbers<[1], [0], [0], [1], [0, 0, 1, 1], [], []>} : vector<8x128xf32>, vector<128x128xf32>, vector<8x128xf32> -> vector<8x128xf32>
    %c0_12 = arith.constant 0 : index
    %c0_13 = arith.constant 0 : index
    %11 = vector.load %arg5[%c0_12, %c0_13] : memref<128x128xf32, #tpu.memory_space<vmem>>, vector<128x128xf32>
    %cst_14 = arith.constant dense<0.000000e+00> : vector<8x128xf32>
    %12 = tpu.matmul %7, %11, %cst_14 {dimension_numbers = #tpu.dot_dimension_numbers<[1], [0], [0], [1], [0, 0, 1, 1], [], []>} : vector<8x128xf32>, vector<128x128xf32>, vector<8x128xf32> -> vector<8x128xf32>
    %13 = arith.addf %10, %12 : vector<8x128xf32>
    %cst_15 = arith.constant 0.000000e+00 : f32
    %14 = vector.broadcast %cst_15 : f32 to vector<8x128xf32>
    %15 = arith.maximumf %13, %14 : vector<8x128xf32>
    %c0_16 = arith.constant 0 : index
    %c0_17 = arith.constant 0 : index
    %16 = vector.load %arg6[%c0_16, %c0_17] : memref<8x128xf32, #tpu.memory_space<vmem>>, vector<8x128xf32>
    tpu.vector_store %arg6[%c0_16, %c0_17], %15 {strides = array<i32>} : memref<8x128xf32, #tpu.memory_space<vmem>>, vector<8x128xf32>,
    return
  }
  func.func @transform_0(%arg0: i32) -> (i32, i32) {
    %c0_i32 = arith.constant 0 : i32
    %c0_i32_0 = arith.constant 0 : i32
    %c0_i32_1 = arith.constant 0 : i32
    return %c0_i32, %c0_i32_0 : i32, i32
  }
  func.func @transform_1(%arg0: i32) -> (i32, i32, i32) {
    %c0_i32 = arith.constant 0 : i32
    %c0_i32_0 = arith.constant 0 : i32
    %c0_i32_1 = arith.constant 0 : i32
    %c0_i32_2 = arith.constant 0 : i32
    return %c0_i32, %c0_i32_0, %c0_i32_1 : i32, i32, i32
  }
  func.func @transform_2(%arg0: i32) -> (i32, i32, i32) {
    %c0_i32 = arith.constant 0 : i32
    %c0_i32_0 = arith.constant 0 : i32
    %c0_i32_1 = arith.constant 0 : i32
    %c0_i32_2 = arith.constant 0 : i32
    return %c0_i32, %c0_i32_0, %c0_i32_1 : i32, i32, i32
  }
  func.func @transform_3(%arg0: i32) -> (i32, i32) {
    %c0_i32 = arith.constant 0 : i32
    %c0_i32_0 = arith.constant 0 : i32
    %c0_i32_1 = arith.constant 0 : i32
    return %c0_i32, %c0_i32_0 : i32, i32
  }
  func.func @transform_4(%arg0: i32) -> (i32, i32) {
    %c0_i32 = arith.constant 0 : i32
    %c0_i32_0 = arith.constant 0 : i32
    %c0_i32_1 = arith.constant 0 : i32
    return %c0_i32, %c0_i32_0 : i32, i32
  }
  func.func @transform_5(%arg0: i32) -> (i32, i32) {
    %c0_i32 = arith.constant 0 : i32
    %c0_i32_0 = arith.constant 0 : i32
    %c0_i32_1 = arith.constant 0 : i32
    return %c0_i32, %c0_i32_0 : i32, i32
  }
}

</mosaic_0001>

<bundles_post_ra>
// kernel: encoder_forward.2
= control target key start
LH: loop header
LB: loop body
LE: loop exit
PB: predicated region body
PF: predicated region fallthrough
CT: control target
= control target key end

     0   :  { %9 = vsyncpa [#allocation3], 0  ;;  %s926_s0 = inlined_call_operand.hbm [shape: f32[8,1024], index: 0, kind: input, shape index: {}]   ;;  %s927_s1 = inlined_call_operand.vmem [shape: f32[1024,128], index: 1, kind: input, shape index: {}]   ;;  %s928_s2 = inlined_call_operand.vmem [shape: f32[2,8,128], index: 2, kind: output, shape index: {0}]   ;;  %s929_s3 = inlined_call_operand.vmem [shape: f32[2,8,1], index: 3, kind: output, shape index: {1}]  }
   0x1   :  { %11 = vsyncpa [#allocation3 + $0x1], 0  ;;  %s745_s12 = smov 0   ;;  %s747_s13 = smov 0  }
   0x2   :  { %s749_s14 = smov 0   ;;  %s751_s15 = smov 0  }
   0x3   :  { %s753_s16 = smov 0   ;;  %s755_s17 = smov 0  }
   0x4   :  { %s757_s18 = smov 0   ;;  %s759_s19 = smov 0  }
   0x5 LB: > { %s497_s20 = sadd.s32 4294967295, %s721_s19   ;;  %s26_s21 = sadd.s32 1, %s713_s17  ;;  %s721_s19 = sphi %s759_s19, %s17_s19   ;;  %s717_s18 = sphi %s757_s18, %s939_s18   ;;  %s713_s17 = sphi %s755_s17, %s938_s17   ;;  %s709_s16 = sphi %s753_s16, %s937_s16   ;;  %s705_s15 = sphi %s751_s15, %s936_s15   ;;  %s701_s14 = sphi %s749_s14, %s935_s14   ;;  %s697_s13 = sphi %s747_s13, %s934_s13   ;;  %s693_s12 = sphi %s745_s12, %s933_s12  }
   0x6   : > { %p27_p0 = scmp.ge.s32.totalorder %s26_s21, 2  ;;  %s29_s22 = sadd.s32 1, %s717_s18 }
   0x7   : > { %s499_s23 = sshll.u32 %s717_s18, 1  ;;  %s40_s24 = sadd.s32 1, %s701_s14 }
   0x8   : > { %s941_s21 = smov (%p27_p0, %s26_s21), 0  ;;  %s943_s22 = smov (!%p27_p0, %s29_s22), %s717_s18 }
   0x9   : > { %s34_s25 = sadd.s32 %s713_s17, %s499_s23  ;;  %p47_p1 = scmp.ne.s32.totalorder %s701_s14, %s697_s13 }
   0xa   : > { %p31_p2 = scmp.ge.s32.totalorder %s943_s22, 2  ;;  %p48_p3 = scmp.eq.s32.totalorder %s721_s19, 0 }
   0xb   : > { %p53_p4 = scmp.ne.s32.totalorder %s697_s13, %s693_s12  ;;  %p54_p5 = scmp.eq.s32.totalorder %s497_s20, 0 }
   0xc   : > { %s945_s22 = smov (%p31_p2, %s943_s22), 0  ;;  %p798_p6 = por %p48_p3, %p47_p1 }
   0xd   : > { %p802_p7 = por %p54_p5, %p53_p4  ;;  %s500_s28 = sshll.u32 %s945_s22, 1 }
   0xe   : > { %s36_s29 = sadd.s32 %s500_s28, %s941_s21  ;;  %p561_p8 = scmp.lt.s32.totalorder %s721_s19, 4 }
   0xf   : > { %s37_s30 = ssub.s32 %s34_s25, %s36_s29  ;;  %s159_s4 = sand.u32 1, %s701_s14  }
  0x10   : > { %p38_p9 = scmp.eq.s32.totalorder %s37_s30, 0  ;;  %s505_s5 = sshll.u32 %s159_s4, 4 }
  0x11   : > { %s519_s6 = sshll.u32 %s34_s25, 8  ;;  %s163_s11 = scalar_lea.vmem [#allocation2], %s505_s5 }
  0x12   : > { %s811_s7 = scalar_select %p38_p9, %s701_s14, %s40_s24  }
  0x13   : > { %s171_s10 = scalar_lea.hbm %s926_s0, %s519_s6  ;;  %s173_s12 = sshll.u32 %s163_s11, 4  ;;  %s174_s12 = int_to_ptr.vmem [resolvable:$true] %s173_s12 }
  0x14   : > { %p818_p10 = pnand %p561_p8, %p798_p6  ;;  %p509_p11 = scmp.ge.s32.totalorder %s721_s19, 1 }
  0x15   : > { %p191_p12 = scmp.lt.s32.totalorder %s721_s19, 5  ;;  %s160_s23 = scalar_lea.sflag [#allocation3], %s159_s4 }
  0x16   : > { %p629_p13 = pneg %p818_p10  ;;  %s640_s24 = scalar_lea.vmem %s174_s12, 256 }
  0x17   : > { %p641_p0 = scmp.ne.s32.totalorder %s174_s12, %s640_s24  ;;  %s723_s25 = smov [#allocation2]  }
  0x18   : > { %s645_s28 = sshll.u32 %s723_s25, 4  ;;  %s646_s28 = int_to_ptr.vmem [resolvable:$false] %s645_s28 }
  0x19   : > { %p643_p1 = pnand %p641_p0, %p629_p13  ;;  %s647_s29 = scalar_lea.vmem %s646_s28, 512 }
  0x1a   : > { %p648_p3 = scmp.lt.s32.totalorder %s174_s12, %s646_s28  ;;  %p649_p4 = scmp.lt.s32.totalorder %s647_s29, %s640_s24 }
  0x1b   : > { %p644_p2 = pneg %p643_p1 }
  0x1c   : > { %p650_p5 = por %p649_p4, %p648_p3 }
  0x1e   : > { %p651_p6 = pnand %p650_p5, %p644_p2 }
  0x20   : > { %654 = shalt.err (!%p651_p6)
}
  0x21   : > { %560 = dma.hbm_to_vmem [thread:$0]  (!%p818_p10), %s171_s10, 256, %s174_s12, %s160_s23  }
  0x22   : > { %p192_p8 = pnand %p509_p11, %p191_p12 }
  0x23   : > { %s197_s26 = sand.u32 (!%p192_p8), 1, %s697_s13  }
  0x24   : > { %195 = sbr.rel (%p192_p8) target bundleno = 287 (0x11f), region = 28  ;;  %s833_s30 = sshll.u32 (!%p192_p8), %s197_s26, 4 }
  0x25   : > { %s198_s4 = scalar_lea.sflag (!%p192_p8), [#allocation3], %s197_s26  ;;  %s201_s5 = scalar_lea.vmem (!%p192_p8), [#allocation2], %s833_s30 }
  0x29   : > { %688 = dma.done.wait (%p802_p7), %s198_s4, 256  }
  0x2a   : > { %690 = vsyncadd (%p802_p7), %s198_s4, 4294967040  ;;  %s511_s6 = sshll.u32 %s709_s16, 1  ;;  %p247_p9 = scmp.lt.s32.totalorder %s709_s16, 1 }
  0x2b   : > { %s238_s8 = sadd.s32 %s705_s15, %s511_s6  ;;  %p516_p7 = scmp.ne.s32.totalorder %s705_s15, 0 }
  0x2c   : > { %s512_s9 = sshll.u32 %s238_s8, 5  ;;  %s947_s16 = smov (!%p247_p9, %s709_s16), 1 }
  0x2d   : > { %p240_p10 = scmp.lt.s32.totalorder %s512_s9, 127  ;;  %s514_s10 = sshll.u32 %s947_s16, 3 }
  0x2e   : > { %s847_s23 = scalar_lea.vmem %s928_s2, %s514_s10  ;;  %s857_s26 = scalar_lea.vmem %s929_s3, %s514_s10 }
  0x2f   : > { %s949_s9 = smov (!%p240_p10, %s512_s9), 127  ;;  %258 = sbr.rel (%p516_p7) target bundleno = 54 (0x36), region = 36 }
  0x30   : > { %s513_s11 = sshll.u32 %s949_s9, 3 }
  0x31   : > { %s852_s25 = scalar_lea.vmem %s927_s1, %s513_s11 }
  0x34   : > { %vm260_vm0 = vcmask 7168   ;;  %v724_v0 = vmov 0.0  }
  0x35   : > { %259 = vst [vmem:[%s847_s23] sm:$0xff] %v724_v0  ;;  %261 = vst.msk [vmem:[%s857_s26] sm:$0xff] %vm260_vm0, %v724_v0 }
  0x36 PF: > { %v296_v1 = vld [vmem:[%s852_s25 + $0xf8] sm:$0xff]  ;;  %v295_v3 = vld [vmem:[%s852_s25 + $0xf0] sm:$0xff]  ;;  %v294_v5 = vld [vmem:[%s852_s25 + $0xe8] sm:$0xff]  ;;  %vm374_vm1 = vcmask 7168  }
  0x37   : > { %v280_v2 = vld [vmem:[%s852_s25 + $0x78] sm:$0xff]  ;;  %520 = vmatprep.subr.mxu0 %v296_v1  ;;  %v279_v4 = vld [vmem:[%s852_s25 + $0x70] sm:$0xff]  ;;  %v278_v6 = vld [vmem:[%s852_s25 + $0x68] sm:$0xff] }
  0x38   : > { %521 = vmatpush3.msra.mxu0 %v280_v2  ;;  %v293_v7 = vld [vmem:[%s852_s25 + $0xe0] sm:$0xff]  ;;  %v292_v9 = vld [vmem:[%s852_s25 + $0xd8] sm:$0xff]  ;;  %v291_v11 = vld [vmem:[%s852_s25 + $0xd0] sm:$0xff] }
  0x39   : > { %522 = vmatprep.subr.mxu0 %v295_v3  ;;  %v277_v8 = vld [vmem:[%s852_s25 + $0x60] sm:$0xff]  ;;  %v276_v10 = vld [vmem:[%s852_s25 + $0x58] sm:$0xff]  ;;  %v275_v12 = vld [vmem:[%s852_s25 + $0x50] sm:$0xff] }
  0x3a   : > { %523 = vmatpush3.msra.mxu0 %v279_v4  ;;  %v290_v13 = vld [vmem:[%s852_s25 + $0xc8] sm:$0xff]  ;;  %v262_v16 = vld [vmem:[%s201_s5] sm:$0xff]  ;;  %v288_v20 = vld [vmem:[%s852_s25 + $0xb8] sm:$0xff] }
  0x3b   : > { %524 = vmatprep.subr.mxu0 %v294_v5  ;;  %v263_v14 = vld [vmem:[%s201_s5 + $0x8] sm:$0xff]  ;;  %v289_v17 = vld [vmem:[%s852_s25 + $0xc0] sm:$0xff]  ;;  %v287_v22 = vld [vmem:[%s852_s25 + $0xb0] sm:$0xff] }
  0x3c   : > { %525 = vmatpush3.msra.mxu0 %v278_v6  ;;  %v274_v15 = vld [vmem:[%s852_s25 + $0x48] sm:$0xff]  ;;  %361 = vmatprep.mubr.f32.mxu0 %v263_v14  ;;  %v370_v18 = vadd.f32 %v263_v14, %v262_v16  ;;  %v273_v19 = vld [vmem:[%s852_s25 + $0x40] sm:$0xff]  ;;  %v272_v21 = vld [vmem:[%s852_s25 + $0x38] sm:$0xff] }
  0x3d   : > { %526 = vmatprep.subr.mxu0 %v293_v7  ;;  %v271_v23 = vld [vmem:[%s852_s25 + $0x30] sm:$0xff]  ;;  %v286_v24 = vld [vmem:[%s852_s25 + $0xa8] sm:$0xff]  ;;  %v285_v26 = vld [vmem:[%s852_s25 + $0xa0] sm:$0xff] }
  0x3e   : > { %527 = vmatpush3.msra.mxu0 %v277_v8  ;;  %371 = vadd.xlane.f32.xlu0 %v370_v18  ;;  %v270_v25 = vld [vmem:[%s852_s25 + $0x28] sm:$0xff]  ;;  %v269_v27 = vld [vmem:[%s852_s25 + $0x20] sm:$0xff]  ;;  %v284_v28 = vld [vmem:[%s852_s25 + $0x98] sm:$0xff] }
  0x3f   : > { %528 = vmatprep.subr.mxu0 %v292_v9  ;;  %v268_v29 = vld [vmem:[%s852_s25 + $0x18] sm:$0xff]  ;;  %v283_v30 = vld [vmem:[%s852_s25 + $0x90] sm:$0xff]  ;;  %v282_v32 = vld [vmem:[%s852_s25 + $0x88] sm:$0xff] }
  0x40   : > { %529 = vmatpush3.msra.mxu0 %v276_v10  ;;  %v267_v31 = vld [vmem:[%s852_s25 + $0x10] sm:$0xff]  ;;  %v266_v33 = vld [vmem:[%s852_s25 + $0x8] sm:$0xff]  ;;  %v281_v34 = vld [vmem:[%s852_s25 + $0x80] sm:$0xff] }
  0x41   : > { %530 = vmatprep.subr.mxu0 %v291_v11  ;;  %v265_v35 = vld [vmem:[%s852_s25] sm:$0xff] }
  0x42   : > { %531 = vmatpush3.msra.mxu0 %v275_v12  ;;  %v369_v36 = vld [vmem:[%s857_s26] sm:$0xff] }
  0x43   : > { %532 = vmatprep.subr.mxu0 %v290_v13  ;;  %v264_v40 = vld [vmem:[%s847_s23] sm:$0xff] }
  0x44   : > { %533 = vmatpush3.msra.mxu0 %v274_v15 }
  0x45   : > { %534 = vmatprep.subr.mxu0 %v289_v17 }
  0x46   : > { %535 = vmatpush3.msra.mxu0 %v273_v19 }
  0x47   : > { %536 = vmatprep.subr.mxu0 %v288_v20 }
  0x48   : > { %537 = vmatpush3.msra.mxu0 %v272_v21 }
  0x49   : > { %538 = vmatprep.subr.mxu0 %v287_v22 }
  0x4a   : > { %539 = vmatpush3.msra.mxu0 %v271_v23 }
  0x4b   : > { %540 = vmatprep.subr.mxu0 %v286_v24 }
  0x4c   : > { %541 = vmatpush3.msra.mxu0 %v270_v25 }
  0x4d   : > { %542 = vmatprep.subr.mxu0 %v285_v26 }
  0x4e   : > { %543 = vmatpush3.msra.mxu0 %v269_v27 }
  0x4f   : > { %544 = vmatprep.subr.mxu0 %v284_v28 }
  0x50   : > { %545 = vmatpush3.msra.mxu0 %v268_v29 }
  0x51   : > { %546 = vmatprep.subr.mxu0 %v283_v30 }
  0x52   : > { %547 = vmatpush3.msra.mxu0 %v267_v31 }
  0x53   : > { %548 = vmatprep.subr.mxu0 %v282_v32 }
  0x54   : > { %549 = vmatpush3.msra.mxu0 %v266_v33 }
  0x55   : > { %550 = vmatprep.subr.mxu0 %v281_v34 }
  0x56   : > { %551 = vmatpush3.msra.mxu0 %v265_v35 }
  0x57   : > { %362 = vmatmul.mubr.f32.vlgmr.msra.gmra.mxu0 %v262_v16 }
  0xc7   : > { %v372_v37 = vpop.xlane.xlu0 %371 }
  0xc8   : > { %v373_v38 = vadd.f32 %v372_v37, %v369_v36 }
  0xca   : > { %375 = vst.msk [vmem:[%s857_s26] sm:$0xff] %vm374_vm1, %v373_v38 }
 0x117   : > { %v552_v39 = vpop.f32.mrf.mxu0 }
 0x119   : > { %v553_v41 = vpop.f32.mrf.mxu0 }
 0x11a   : > { %v554_v42 = vadd.f32 %v553_v41, %v552_v39 }
 0x11c   : > { %v367_v43 = vadd.f32 %v554_v42, %v264_v40 }
 0x11e   : > { %368 = vst [vmem:[%s847_s23] sm:$0xff] %v367_v43 }
 0x11f PF: > { %s17_s19 = sadd.s32 1, %s721_s19   ;;  %s933_s12 = smov %s697_s13 }
 0x120   : > { %p14_p11 = scmp.ge.s32.totalorder %s17_s19, 6   ;;  %s934_s13 = smov %s701_s14 }
 0x121   : > { %s935_s14 = smov %s811_s7  ;;  %s936_s15 = smov %s713_s17 }
 0x122   : > { %s937_s16 = smov %s717_s18  ;;  %s938_s17 = smov %s941_s21 }
 0x123   : > { %s939_s18 = smov %s945_s22  ;;  %16 = sbr.rel (!%p14_p11) target bundleno = 5 (0x5), region = 87 }
 0x128   :  { %409 = vsyncpa [#allocation3], 1 }
 0x129   :  { %411 = vsyncpa [#allocation3 + $0x1], 1 }

// kernel: encoder_forward.3
= control target key start
LH: loop header
LB: loop body
LE: loop exit
PB: predicated region body
PF: predicated region fallthrough
CT: control target
= control target key end

     0   :  { %vm26_vm0 = vcmask 7168   ;;  %v360_v3 = vmov 0   ;;  %v361_v6 = vmov 0.0   ;;  %s542_s0 = inlined_call_operand.vmem [shape: f32[8,128], index: 0, kind: input, shape index: {}]   ;;  %s543_s1 = inlined_call_operand.vmem [shape: f32[2,8,128], index: 1, kind: input, shape index: {}]   ;;  %s544_s2 = inlined_call_operand.vmem [shape: f32[2,8,1], index: 2, kind: input, shape index: {}]   ;;  %s545_s3 = inlined_call_operand.vmem [shape: f32[128,128], index: 3, kind: input, shape index: {}]   ;;  %s546_s4 = inlined_call_operand.vmem [shape: f32[128,128], index: 4, kind: input, shape index: {}]   ;;  %s547_s5 = inlined_call_operand.hbm [shape: f32[8,128], index: 5, kind: output, shape index: {}]  }
   0x1   :  { %v24_v0 = vld [vmem:[%s544_s2] sm:$0xff]  ;;  %v25_v1 = vld [vmem:[%s544_s2 + $0x8] sm:$0xff]  ;;  %v54_v2 = vld [vmem:[%s545_s3 + $0x78] sm:$0xff]  ;;  %335 = vset.pattern.permute.xlu0 %v360_v3  ;;  %296 = vmatprep.subr.mxu1 %v361_v6 }
   0x2   :  { %v27_v4 = vsel %vm26_vm0, %v24_v0, 0.0  ;;  %v28_v5 = vsel %vm26_vm0, %v25_v1, 0.0  ;;  %v70_v7 = vld [vmem:[%s546_s4 + $0x78] sm:$0xff]  ;;  %v53_v8 = vld [vmem:[%s545_s3 + $0x70] sm:$0xff]  ;;  %297 = vmatpush3.msra.mxu1 %v54_v2  ;;  %261 = vmatprep.subr.mxu0 %v361_v6  ;;  %v52_v11 = vld [vmem:[%s545_s3 + $0x68] sm:$0xff] }
   0x3   :  { %v29_v9 = vadd.f32 %v28_v5, %v27_v4  ;;  %v69_v10 = vld [vmem:[%s546_s4 + $0x70] sm:$0xff]  ;;  %298 = vmatprep.subr.mxu1 %v361_v6  ;;  %262 = vmatpush3.msra.mxu0 %v70_v7  ;;  %v68_v13 = vld [vmem:[%s546_s4 + $0x68] sm:$0xff]  ;;  %v51_v14 = vld [vmem:[%s545_s3 + $0x60] sm:$0xff] }
   0x4   :  { %299 = vmatpush3.msra.mxu1 %v53_v8  ;;  %263 = vmatprep.subr.mxu0 %v361_v6  ;;  %v67_v15 = vld [vmem:[%s546_s4 + $0x60] sm:$0xff]  ;;  %v50_v16 = vld [vmem:[%s545_s3 + $0x58] sm:$0xff]  ;;  %v49_v18 = vld [vmem:[%s545_s3 + $0x50] sm:$0xff] }
   0x5   :  { %v30_v12 = vmax.f32 %v29_v9, 1.0  ;;  %300 = vmatprep.subr.mxu1 %v361_v6  ;;  %264 = vmatpush3.msra.mxu0 %v69_v10  ;;  %v66_v17 = vld [vmem:[%s546_s4 + $0x58] sm:$0xff]  ;;  %v65_v19 = vld [vmem:[%s546_s4 + $0x50] sm:$0xff]  ;;  %v48_v20 = vld [vmem:[%s545_s3 + $0x48] sm:$0xff] }
   0x6   :  { %301 = vmatpush3.msra.mxu1 %v52_v11  ;;  %265 = vmatprep.subr.mxu0 %v361_v6 }
   0x7   :  { %33 = vperm.xlu0 %335, %v30_v12   ;;  %302 = vmatprep.subr.mxu1 %v361_v6 }
   0x8   :  { %266 = vmatpush3.msra.mxu0 %v68_v13  ;;  %303 = vmatpush3.msra.mxu1 %v51_v14 }
   0x9   :  { %267 = vmatprep.subr.mxu0 %v361_v6  ;;  %304 = vmatprep.subr.mxu1 %v361_v6 }
   0xa   :  { %268 = vmatpush3.msra.mxu0 %v67_v15  ;;  %305 = vmatpush3.msra.mxu1 %v50_v16 }
   0xb   :  { %269 = vmatprep.subr.mxu0 %v361_v6  ;;  %306 = vmatprep.subr.mxu1 %v361_v6 }
   0xc   :  { %270 = vmatpush3.msra.mxu0 %v66_v17  ;;  %307 = vmatpush3.msra.mxu1 %v49_v18 }
   0xd   :  { %10 = vsyncpa [#allocation3], 0  ;;  %271 = vmatprep.subr.mxu0 %v361_v6  ;;  %308 = vmatprep.subr.mxu1 %v361_v6  ;;  %v64_v21 = vld [vmem:[%s546_s4 + $0x48] sm:$0xff]  ;;  %v47_v22 = vld [vmem:[%s545_s3 + $0x40] sm:$0xff]  ;;  %vm362_vm1 = vmmov 0  }
   0xe   :  { %272 = vmatpush3.msra.mxu0 %v65_v19  ;;  %309 = vmatpush3.msra.mxu1 %v48_v20  ;;  %v63_v23 = vld [vmem:[%s546_s4 + $0x40] sm:$0xff]  ;;  %v46_v24 = vld [vmem:[%s545_s3 + $0x38] sm:$0xff]  ;;  %v45_v26 = vld [vmem:[%s545_s3 + $0x30] sm:$0xff] }
   0xf   :  { %273 = vmatprep.subr.mxu0 %v361_v6  ;;  %310 = vmatprep.subr.mxu1 %v361_v6  ;;  %v62_v25 = vld [vmem:[%s546_s4 + $0x38] sm:$0xff]  ;;  %v61_v27 = vld [vmem:[%s546_s4 + $0x30] sm:$0xff]  ;;  %v44_v28 = vld [vmem:[%s545_s3 + $0x28] sm:$0xff] }
  0x10   :  { %274 = vmatpush3.msra.mxu0 %v64_v21  ;;  %311 = vmatpush3.msra.mxu1 %v47_v22  ;;  %v60_v29 = vld [vmem:[%s546_s4 + $0x28] sm:$0xff]  ;;  %v43_v30 = vld [vmem:[%s545_s3 + $0x20] sm:$0xff]  ;;  %v42_v32 = vld [vmem:[%s545_s3 + $0x18] sm:$0xff] }
  0x11   :  { %275 = vmatprep.subr.mxu0 %v361_v6  ;;  %312 = vmatprep.subr.mxu1 %v361_v6  ;;  %v59_v31 = vld [vmem:[%s546_s4 + $0x20] sm:$0xff]  ;;  %v58_v33 = vld [vmem:[%s546_s4 + $0x18] sm:$0xff]  ;;  %v41_v34 = vld [vmem:[%s545_s3 + $0x10] sm:$0xff] }
  0x12   :  { %276 = vmatpush3.msra.mxu0 %v63_v23  ;;  %313 = vmatpush3.msra.mxu1 %v46_v24  ;;  %v57_v35 = vld [vmem:[%s546_s4 + $0x10] sm:$0xff]  ;;  %v40_v36 = vld [vmem:[%s545_s3 + $0x8] sm:$0xff]  ;;  %v39_v38 = vld [vmem:[%s545_s3] sm:$0xff] }
  0x13   :  { %277 = vmatprep.subr.mxu0 %v361_v6  ;;  %314 = vmatprep.subr.mxu1 %v361_v6  ;;  %v56_v37 = vld [vmem:[%s546_s4 + $0x8] sm:$0xff]  ;;  %v38_v39 = vld [vmem:[%s542_s0] sm:$0xff] }
  0x14   :  { %278 = vmatpush3.msra.mxu0 %v62_v25  ;;  %315 = vmatpush3.msra.mxu1 %v45_v26  ;;  %v55_v40 = vld [vmem:[%s546_s4] sm:$0xff]  ;;  %v22_v43 = vld [vmem:[%s543_s1 + $0x8] sm:$0xff]  ;;  %s363_s4 = smov [#allocation2]  }
  0x15   :  { %279 = vmatprep.subr.mxu0 %v361_v6  ;;  %316 = vmatprep.subr.mxu1 %v361_v6  ;;  %v21_v42 = vld [vmem:[%s543_s1] sm:$0xff]  ;;  %s219_s12 = sshll.u32 %s363_s4, 4  ;;  %s220_s12 = int_to_ptr.vmem [resolvable:$true] %s219_s12 }
  0x16   :  { %280 = vmatpush3.msra.mxu0 %v61_v27  ;;  %317 = vmatpush3.msra.mxu1 %v44_v28  ;;  %v23_v44 = vadd.f32 %v22_v43, %v21_v42  ;;  %s338_s13 = scalar_lea.vmem %s220_s12, 128  ;;  %p343_p1 = scmp.lt.s32.totalorder %s220_s12, %s220_s12 }
  0x17   :  { %281 = vmatprep.subr.mxu0 %v361_v6  ;;  %318 = vmatprep.subr.mxu1 %v361_v6  ;;  %p339_p0 = scmp.ne.s32.totalorder %s220_s12, %s338_s13  ;;  %p344_p2 = scmp.lt.s32.totalorder %s338_s13, %s338_s13 }
  0x18   :  { %282 = vmatpush3.msra.mxu0 %v60_v29  ;;  %319 = vmatpush3.msra.mxu1 %v43_v30 }
  0x19   :  { %283 = vmatprep.subr.mxu0 %v361_v6  ;;  %320 = vmatprep.subr.mxu1 %v361_v6  ;;  %p345_p3 = por %p344_p2, %p343_p1 }
  0x1a   :  { %284 = vmatpush3.msra.mxu0 %v59_v31  ;;  %321 = vmatpush3.msra.mxu1 %v42_v32 }
  0x1b   :  { %285 = vmatprep.subr.mxu0 %v361_v6  ;;  %322 = vmatprep.subr.mxu1 %v361_v6  ;;  %p346_p4 = pnand %p345_p3, %p339_p0 }
  0x1c   :  { %286 = vmatpush3.msra.mxu0 %v58_v33  ;;  %323 = vmatpush3.msra.mxu1 %v41_v34 }
  0x1d   :  { %287 = vmatprep.subr.mxu0 %v361_v6  ;;  %324 = vmatprep.subr.mxu1 %v361_v6 }
  0x1e   :  { %288 = vmatpush3.msra.mxu0 %v57_v35  ;;  %325 = vmatpush3.msra.mxu1 %v40_v36 }
  0x1f   :  { %289 = vmatprep.subr.mxu0 %v361_v6  ;;  %326 = vmatprep.subr.mxu1 %v361_v6 }
  0x20   :  { %290 = vmatpush3.msra.mxu0 %v56_v37  ;;  %327 = vmatpush3.msra.mxu1 %v39_v38 }
  0x21   :  { %328 = vmatprep.mubr.msk.f32.mxu1 %vm362_vm1, %v361_v6  ;;  %291 = vmatprep.subr.mxu0 %v361_v6 }
  0x22   :  { %329 = vmatmul.mubr.f32.vlgmr.msra.gmra.mxu1 %v38_v39  ;;  %292 = vmatpush3.msra.mxu0 %v55_v40 }
  0x23   :  { %293 = vmatprep.mubr.msk.f32.mxu0 %vm362_vm1, %v361_v6 }
  0x82   :  { %v34_v41 = vpop.permute.xlu0 %33 }
  0x83   :  { %336 = vrcp.f32 %v34_v41 }
  0x90   :  { %v337_v45 = vpop.eup %336 }
  0x91   :  { %v37_v46 = vmul.f32 %v337_v45, %v23_v44 }
  0x93   :  { %294 = vmatmul.mubr.f32.vlgmr.msra.gmra.mxu0 %v37_v46 }
  0xe2   :  { %v207_v47 = vpop.f32.mrf.mxu1 }
  0xe4   :  { %v330_v48 = vpop.f32.mrf.mxu1 }
 0x153   :  { %v137_v49 = vpop.f32.mrf.mxu0 }
 0x154   :  { %v208_v50 = vadd.f32 %v207_v47, %v137_v49 }
 0x155   :  { %v295_v51 = vpop.f32.mrf.mxu0 }
 0x156   :  { %v211_v52 = vmax.f32 %v208_v50, 0.0 }
 0x158   :  { %212 = vst [vmem:[#allocation2] sm:$0xff] %v211_v52 }
 0x159   :  { %349 = shalt.err (!%p346_p4)
}
 0x15a   :  { %222 = dma.vmem_to_hbm [thread:$0]  %s220_s12, 128, %s547_s5, [#allocation3]  }
 0x15b   :  { %358 = dma.done.wait [#allocation3], 128  }
 0x15c   :  { %359 = vsyncadd [#allocation3], 4294967168 }
 0x15d   :  { %226 = vsyncpa [#allocation3], 1 }

</bundles_post_ra>
